<compile_context>
chip_gen: v6e
topology: v6e:2x2x1
jax: 0.10.0
libtpu: 0.0.40
codegen_flags: <defaults>
</compile_context>

<pallas_src>
import functools

import jax
import jax.numpy as jnp
from jax.experimental import pallas as pl
from jax.experimental.pallas import tpu as pltpu

IGNORE_INDEX = -100


# -----------------------------------------------------------------------------
# Grid-less kernel for tiny inputs (whole arrays in VMEM, scalar loss in SMEM)
# -----------------------------------------------------------------------------
def _ce_kernel_small(logits_ref, target_ref, loss_ref):
    x = logits_ref[...].astype(jnp.float32)          # up-cast (if any) in-kernel
    tgt = target_ref[...]                            # (B, 1) int32
    m = jnp.max(x, axis=-1, keepdims=True)
    lse = m + jnp.log(jnp.sum(jnp.exp(x - m), axis=-1, keepdims=True))
    cls = jax.lax.broadcasted_iota(jnp.int32, x.shape, 1)
    picked = jnp.sum(jnp.where(cls == tgt, x, 0.0), axis=-1, keepdims=True)
    valid = tgt != IGNORE_INDEX
    nll = jnp.where(valid, lse - picked, 0.0)         # select, not multiply
    cnt = jnp.where(valid, 1.0, 0.0)
    loss_ref[0] = jnp.sum(nll) / jnp.sum(cnt)         # 0/0 -> NaN, same as PyTorch


# -----------------------------------------------------------------------------
# Tiled kernel: batch-tiled + class-tiled online log-sum-exp reduction
# grid = (n_outer [parallel], n_inner [arbitrary], n_c [arbitrary])
# -----------------------------------------------------------------------------
def _ce_kernel_tiled(logits_ref, target_ref, onll_ref, ocnt_ref,
                     m_ref, l_ref, p_ref, acc_nll_ref, acc_cnt_ref,
                     *, num_classes, block_c):
    b = pl.program_id(1)
    c = pl.program_id(2)
    n_inner = pl.num_programs(1)
    n_c = pl.num_programs(2)

    @pl.when(jnp.logical_and(b == 0, c == 0))
    def _():                                           # per-outer-block reset
        acc_nll_ref[...] = jnp.zeros_like(acc_nll_ref)
        acc_cnt_ref[...] = jnp.zeros_like(acc_cnt_ref)

    @pl.when(c == 0)
    def _():                                           # per-batch-block reset
        m_ref[...] = jnp.full_like(m_ref, -jnp.inf)
        l_ref[...] = jnp.zeros_like(l_ref)
        p_ref[...] = jnp.zeros_like(p_ref)

    x = logits_ref[...].astype(jnp.float32)            # (bb, bc) f32 math (v5e-safe)
    tgt = target_ref[...]                              # (bb, 1) int32
    cls = jax.lax.broadcasted_iota(jnp.int32, x.shape, 1) + c * block_c
    if num_classes % block_c != 0:                     # static: ragged last class tile
        x = jnp.where(cls < num_classes, x, -jnp.inf)

    # online log-sum-exp update
    m_prev = m_ref[...]
    m_new = jnp.maximum(m_prev, jnp.max(x, axis=-1, keepdims=True))
    alpha = jnp.exp(m_prev - m_new)
    l_ref[...] = alpha * l_ref[...] + jnp.sum(jnp.exp(x - m_new), axis=-1,
                                              keepdims=True)
    p_ref[...] = p_ref[...] + jnp.sum(jnp.where(cls == tgt, x, 0.0), axis=-1,
                                      keepdims=True)
    m_ref[...] = m_new

    @pl.when(c == n_c - 1)
    def _():                                           # finalize this batch block
        valid = tgt != IGNORE_INDEX                    # padded / garbage rows ignored
        nll = (m_ref[...] + jnp.log(l_ref[...])) - p_ref[...]
        acc_nll_ref[...] += jnp.where(valid, nll, 0.0)
        acc_cnt_ref[...] += jnp.where(valid, 1.0, 0.0)

    @pl.when(jnp.logical_and(b == n_inner - 1, c == n_c - 1))
    def _():                                           # emit per-outer partials
        onll_ref[0] = acc_nll_ref[...]
        ocnt_ref[0] = acc_cnt_ref[...]


# -----------------------------------------------------------------------------
# Wrapper
# -----------------------------------------------------------------------------
def _choose_blocks(B, C, itemsize):
    """Pick (block_b, block_c): lane-aligned, multi-MiB streaming blocks."""
    block_c = C if C <= 2048 else 2048                 # multiple of 128 or full C
    per_buf_target = 4 * 1024 * 1024                   # ~8 MiB per double-buffered pair
    bb = per_buf_target // max(1, block_c * itemsize)
    bb = max(8, min(1024, (bb // 8) * 8))
    bb = min(bb, max(8, ((B + 7) // 8) * 8))           # don't exceed rounded-up batch
    return bb, block_c


def cross_entropy_ignore_index(logits, target, *, block_b=None, block_c=None):
    """loss = CrossEntropy(logits (B,C), target (B,) ints, ignore_index=-100)."""
    B, C = logits.shape
    target = target.astype(jnp.int32).reshape(B, 1)
    itemsize = jnp.dtype(logits.dtype).itemsize
    force_tiled = (block_b is not None) or (block_c is not None)

    cost = pl.CostEstimate(flops=6 * B * C,
                           transcendentals=B * C,
                           bytes_accessed=B * C * itemsize + B * 4 + 8)

    # Tiny inputs: one grid-less call, whole-array VMEM blocks, SMEM scalar out.
    if not force_tiled and B * C * itemsize <= (1 << 20):
        out = pl.pallas_call(
            _ce_kernel_small,
            out_shape=jax.ShapeDtypeStruct((1,), jnp.float32),
            in_specs=[pl.BlockSpec(memory_space=pltpu.MemorySpace.VMEM),
                      pl.BlockSpec(memory_space=pltpu.MemorySpace.VMEM)],
            out_specs=pl.BlockSpec(memory_space=pltpu.MemorySpace.SMEM),
            cost_estimate=cost,
            compiler_params=pltpu.CompilerParams(
                vmem_limit_bytes=32 * 1024 * 1024),
        )(logits, target)
        return out[0]

    # Tiled streaming path.
    auto_bb, auto_bc = _choose_blocks(B, C, itemsize)
    block_b = auto_bb if block_b is None else block_b
    block_c = auto_bc if block_c is None else min(block_c, C)
    assert block_b % 8 == 0
    assert block_c == C or block_c % 128 == 0

    nb = -(-B // block_b)                               # batch blocks
    nc = -(-C // block_c)                               # class blocks
    n_outer = 2 if (nb >= 2 and nb % 2 == 0) else 1     # v7x: use both TensorCores
    n_inner = nb // n_outer

    # Pad ONLY the tiny target array (ragged tail rows -> IGNORE_INDEX).
    # The large logits tensor is never padded/copied in HBM; the ragged last
    # batch block reads unspecified values that are masked via jnp.where.
    rows = nb * block_b
    if rows != B:
        target = jnp.pad(target, ((0, rows - B), (0, 0)),
                         constant_values=IGNORE_INDEX)

    kernel = functools.partial(_ce_kernel_tiled, num_classes=C, block_c=block_c)
    out_nll, out_cnt = pl.pallas_call(
        kernel,
        out_shape=(jax.ShapeDtypeStruct((n_outer, block_b, 1), jnp.float32),
                   jax.ShapeDtypeStruct((n_outer, block_b, 1), jnp.float32)),
        grid=(n_outer, n_inner, nc),
        in_specs=[
            pl.BlockSpec((block_b, block_c),
                         lambda o, b, c: (o * n_inner + b, c)),
            pl.BlockSpec((block_b, 1),
                         lambda o, b, c: (o * n_inner + b, 0)),
        ],
        out_specs=(
            pl.BlockSpec((1, block_b, 1), lambda o, b, c: (o, 0, 0)),
            pl.BlockSpec((1, block_b, 1), lambda o, b, c: (o, 0, 0)),
        ),
        scratch_shapes=[
            pltpu.VMEM((block_b, 1), jnp.float32),      # running max m
            pltpu.VMEM((block_b, 1), jnp.float32),      # running sum-exp l
            pltpu.VMEM((block_b, 1), jnp.float32),      # picked logit p
            pltpu.VMEM((block_b, 1), jnp.float32),      # acc sum_nll
            pltpu.VMEM((block_b, 1), jnp.float32),      # acc count
        ],
        compiler_params=pltpu.CompilerParams(
            dimension_semantics=("parallel", "arbitrary", "arbitrary"),
            vmem_limit_bytes=32 * 1024 * 1024,
        ),
        cost_estimate=cost,
    )(logits, target)

    # Tiny final reduce over per-outer partials (n_outer * block_b scalars).
    return jnp.sum(out_nll) / jnp.sum(out_cnt)


def category_loss(outputs, return_dict=False):
    """Equivalent of CategoryLoss.forward(outputs, return_dict)."""
    logits = outputs["category_logits"]
    target = outputs["category"]
    loss = cross_entropy_ignore_index(logits, target)
    if return_dict:
        return {"loss": loss}
    return loss


# -----------------------------------------------------------------------------
# Pure-JAX reference (sanity check of the Pallas kernels)
# -----------------------------------------------------------------------------
def _reference_ce(logits, target):
    logp = jax.nn.log_softmax(logits.astype(jnp.float32), axis=-1)
    valid = target != IGNORE_INDEX
    safe_t = jnp.where(valid, target, 0).astype(jnp.int32)
    nll = -jnp.take_along_axis(logp, safe_t[:, None], axis=-1)[:, 0]
    num = jnp.sum(jnp.where(valid, nll, 0.0))
    den = jnp.sum(valid.astype(jnp.float32))
    return num / den


# -----------------------------------------------------------------------------
# Demo / self-test
# -----------------------------------------------------------------------------
if __name__ == "__main__":
    key = jax.random.PRNGKey(0)
    ks = jax.random.split(key, 8)

    # 1) tiny input: grid-less path (B=8, C=128), with ignored rows
    B, C = 8, 128
    logits = jax.random.normal(ks[0], (B, C), jnp.float32)
    target = jax.random.randint(ks[1], (B,), 0, C, dtype=jnp.int32)
    target = target.at[1].set(IGNORE_INDEX).at[5].set(IGNORE_INDEX)
    outputs = {"category_logits": logits, "category": target}
    loss = category_loss(outputs)
    jax.block_until_ready(loss)
    ref = _reference_ce(logits, target)
    assert jnp.allclose(loss, ref, rtol=1e-5, atol=1e-5), (loss, ref)
    d = category_loss(outputs, return_dict=True)
    assert jnp.allclose(d["loss"], ref, rtol=1e-5, atol=1e-5)

    # 2) tiled path: ragged batch (300 % 64) + ragged class tiles (online LSE)
    B2, C2 = 300, 320
    logits2 = jax.random.normal(ks[2], (B2, C2), jnp.float32)
    target2 = jax.random.randint(ks[3], (B2,), 0, C2, dtype=jnp.int32)
    target2 = jnp.where(jnp.arange(B2) % 7 == 0, IGNORE_INDEX, target2)
    loss2 = cross_entropy_ignore_index(logits2, target2, block_b=64, block_c=128)
    jax.block_until_ready(loss2)
    ref2 = _reference_ce(logits2, target2)
    assert jnp.allclose(loss2, ref2, rtol=1e-5, atol=1e-5), (loss2, ref2)

    # 3) tiled path with dual-TC outer split (n_outer=2) and bf16 logits
    B3, C3 = 512, 256
    logits3 = jax.random.normal(ks[4], (B3, C3), jnp.float32).astype(jnp.bfloat16)
    target3 = jax.random.randint(ks[5], (B3,), 0, C3, dtype=jnp.int32)
    target3 = jnp.where(jnp.arange(B3) % 11 == 0, IGNORE_INDEX, target3)
    loss3 = cross_entropy_ignore_index(logits3, target3, block_b=128, block_c=128)
    jax.block_until_ready(loss3)
    ref3 = _reference_ce(logits3, target3)
    assert jnp.allclose(loss3, ref3, rtol=1e-4, atol=1e-4), (loss3, ref3)

    # 4) automatic tiling on a moderately large, ragged-batch input
    B4, C4 = 1032, 512
    logits4 = jax.random.normal(ks[6], (B4, C4), jnp.float32)
    target4 = jax.random.randint(ks[7], (B4,), 0, C4, dtype=jnp.int32)
    target4 = jnp.where(jnp.arange(B4) % 5 == 0, IGNORE_INDEX, target4)
    loss4 = cross_entropy_ignore_index(logits4, target4)
    jax.block_until_ready(loss4)
    ref4 = _reference_ce(logits4, target4)
    assert jnp.allclose(loss4, ref4, rtol=1e-5, atol=1e-5), (loss4, ref4)

    print("KERNEL_OK")
</pallas_src>

<mosaic_0001>
module attributes {stable_mosaic.version = 11 : i64} {
  func.func @_ce_kernel_small(%arg0: memref<8x128xf32, #tpu.memory_space<vmem>>, %arg1: memref<8x1xi32, #tpu.memory_space<vmem>>, %arg2: memref<1xf32, #tpu.memory_space<smem>>) attributes {dimension_semantics = [], scalar_prefetch = 0 : i64, scratch_operands = 0 : i64, tpu.core_type = #tpu.core_type<tc>} {
    %c0 = arith.constant 0 : index
    %c0_0 = arith.constant 0 : index
    %0 = vector.load %arg0[%c0, %c0_0] : memref<8x128xf32, #tpu.memory_space<vmem>>, vector<8x128xf32>
    %c0_1 = arith.constant 0 : index
    %c0_2 = arith.constant 0 : index
    %1 = vector.load %arg1[%c0_1, %c0_2] : memref<8x1xi32, #tpu.memory_space<vmem>>, vector<8x1xi32>
    %cst = arith.constant dense<0xFF800000> : vector<8xf32>
    %2 = vector.multi_reduction <maximumf>, %0, %cst [1] : vector<8x128xf32> to vector<8xf32>
    %3 = vector.shape_cast %2 : vector<8xf32> to vector<8x1xf32>
    %4 = vector.broadcast %3 : vector<8x1xf32> to vector<8x128xf32>
    %5 = arith.subf %0, %4 : vector<8x128xf32>
    %6 = math.exp %5 : vector<8x128xf32>
    %cst_3 = arith.constant dense<0.000000e+00> : vector<8xf32>
    %7 = vector.multi_reduction <add>, %6, %cst_3 [1] : vector<8x128xf32> to vector<8xf32>
    %8 = vector.shape_cast %7 : vector<8xf32> to vector<8x1xf32>
    %9 = math.log %8 : vector<8x1xf32>
    %10 = arith.addf %3, %9 : vector<8x1xf32>
    %11 = tpu.iota {dimensions = array<i32: 1>} : vector<8x128xi32>
    %12 = vector.broadcast %1 : vector<8x1xi32> to vector<8x128xi32>
    %13 = arith.cmpi eq, %11, %12 : vector<8x128xi32>
    %cst_4 = arith.constant 0.000000e+00 : f32
    %14 = vector.broadcast %cst_4 : f32 to vector<8x128xf32>
    %15 = arith.select %13, %0, %14 : vector<8x128xi1>, vector<8x128xf32>
    %cst_5 = arith.constant dense<0.000000e+00> : vector<8xf32>
    %16 = vector.multi_reduction <add>, %15, %cst_5 [1] : vector<8x128xf32> to vector<8xf32>
    %17 = vector.shape_cast %16 : vector<8xf32> to vector<8x1xf32>
    %c-100_i32 = arith.constant -100 : i32
    %18 = vector.broadcast %c-100_i32 : i32 to vector<8x1xi32>
    %19 = arith.cmpi ne, %1, %18 : vector<8x1xi32>
    %20 = arith.subf %10, %17 : vector<8x1xf32>
    %cst_6 = arith.constant 0.000000e+00 : f32
    %21 = vector.broadcast %cst_6 : f32 to vector<8x1xf32>
    %22 = arith.select %19, %20, %21 : vector<8x1xi1>, vector<8x1xf32>
    %cst_7 = arith.constant 1.000000e+00 : f32
    %cst_8 = arith.constant 0.000000e+00 : f32
    %23 = vector.broadcast %cst_7 : f32 to vector<8x1xf32>
    %24 = vector.broadcast %cst_8 : f32 to vector<8x1xf32>
    %25 = arith.select %19, %23, %24 : vector<8x1xi1>, vector<8x1xf32>
    %26 = vector.shape_cast %22 : vector<8x1xf32> to vector<1x8x1xf32>
    %cst_9 = arith.constant dense<0.000000e+00> : vector<1xf32>
    %27 = vector.multi_reduction <add>, %26, %cst_9 [1, 2] : vector<1x8x1xf32> to vector<1xf32>
    %28 = vector.shape_cast %27 : vector<1xf32> to vector<1x1x1xf32>
    %29 = vector.extract %28[0, 0, 0] : f32 from vector<1x1x1xf32>
    %30 = vector.shape_cast %25 : vector<8x1xf32> to vector<1x8x1xf32>
    %cst_10 = arith.constant dense<0.000000e+00> : vector<1xf32>
    %31 = vector.multi_reduction <add>, %30, %cst_10 [1, 2] : vector<1x8x1xf32> to vector<1xf32>
    %32 = vector.shape_cast %31 : vector<1xf32> to vector<1x1x1xf32>
    %33 = vector.extract %32[0, 0, 0] : f32 from vector<1x1x1xf32>
    %34 = arith.divf %29, %33 : f32
    %c0_11 = arith.constant 0 : index
    %35 = memref.load %arg2[%c0_11] : memref<1xf32, #tpu.memory_space<smem>>
    memref.store %34, %arg2[%c0_11] : memref<1xf32, #tpu.memory_space<smem>>
    return
  }
}

</mosaic_0001>

<bundles_post_ra>
// kernel: tpu_custom_call.1
= control target key start
LH: loop header
LB: loop body
LE: loop exit
PB: predicated region body
PF: predicated region fallthrough
CT: control target
= control target key end

     0   :  { %s130_s0 = inlined_call_operand.vmem [shape: f32[8,128], index: 0, kind: input, shape index: {}]   ;;  %s131_s1 = inlined_call_operand.vmem [shape: s32[8,1], index: 1, kind: input, shape index: {}]   ;;  %s132_s2 = inlined_call_operand.hbm [shape: f32[1], index: 2, kind: output, shape index: {}]  }
   0x1   :  { %v12_v0 = vld [vmem:[%s130_s0] sm:$0xff] }
   0x2   :  { %7 = vsyncpa [#allocation3], 0  ;;  %14 = vmax.xlane.f32.xlu0 %v12_v0  ;;  %v103_v1 = vmov 0   ;;  %v13_v2 = vld [vmem:[%s131_s1] sm:$0xff]  ;;  %v24_v6 = vlaneseq  ;;  %vm37_vm2 = vcmask 7168   ;;  %v104_v18 = vmov 0.0  }
   0x3   :  { %86 = vset.pattern.permute.xlu0 %v103_v1  ;;  %vm33_vm1 = vcmp.ne.s32.totalorder %v13_v2, 4294967196  ;;  %s105_s15 = smov [#allocation2]  }
   0x4   :  { %v25_v7 = vand.u32 127, %v24_v6  ;;  %v36_v19 = vsel %vm33_vm1, 1.0, %v104_v18 }
   0x5   :  { %v48_v21 = vsel %vm37_vm2, %v36_v19, 0.0 }
  0x18   :  { %27 = vperm.xlu0 %86, %v13_v2  }
  0x8b   :  { %v15_v3 = vpop.xlane.xlu0 %14 }
  0x8c   :  { %v16_v4 = vsub.f32 %v12_v0, %v15_v3 }
  0x8e   :  { %v17_v5 = vmul.f32 1.442695, %v16_v4 }
  0x90   :  { %87 = vpow2.f32 %v17_v5 }
  0x93   :  { %v28_v8 = vpop.permute.xlu0 %27 }
  0x94   :  { %vm29_vm0 = vcmp.eq.s32.totalorder %v25_v7, %v28_v8 }
  0x95   :  { %v30_v10 = vsel %vm29_vm0, %v12_v0, 0.0 }
  0x9d   :  { %v88_v9 = vpop.eup %87 }
  0x9e   :  { %19 = vadd.xlane.f32.xlu1 %v88_v9 }
  0xa2   :  { %31 = vadd.xlane.f32.xlu1 %v30_v10 }
 0x127   :  { %v20_v11 = vpop.xlane.xlu1 %19 }
 0x128   :  { %89 = vlog2.f32 %v20_v11 }
 0x12b   :  { %v32_v14 = vpop.xlane.xlu1 %31 }
 0x135   :  { %v90_v12 = vpop.eup %89 }
 0x136   :  { %v22_v13 = vmul.f32 0.6931472, %v90_v12 }
 0x138   :  { %v23_v15 = vadd.f32 %v22_v13, %v15_v3 }
 0x13a   :  { %v34_v16 = vsub.f32 %v23_v15, %v32_v14 }
 0x13c   :  { %v35_v17 = vsel %vm33_vm1, %v34_v16, 0.0 }
 0x13d   :  { %v38_v20 = vsel %vm37_vm2, %v35_v17, 0.0 }
 0x13e   :  { %39 = vadd.xlane.f32.xlu1 %v38_v20 }
 0x142   :  { %49 = vadd.xlane.f32.xlu1 %v48_v21 }
 0x1c7   :  { %v40_v22 = vpop.xlane.xlu1 %39 }
 0x1c8   :  { %v41_v23 = vrot.slane %v40_v22, 4 }
 0x1ca   :  { %v42_v24 = vadd.f32 %v41_v23, %v40_v22 }
 0x1cb   :  { %v50_v25 = vpop.xlane.xlu1 %49 }
 0x1cc   :  { %v43_v26 = vrot.slane %v42_v24, 2  ;;  %v51_v27 = vrot.slane %v50_v25, 4 }
 0x1ce   :  { %v52_v28 = vadd.f32 %v51_v27, %v50_v25  ;;  %v44_v29 = vadd.f32 %v43_v26, %v42_v24 }
 0x1d0   :  { %v53_v30 = vrot.slane %v52_v28, 2  ;;  %v45_v31 = vrot.slane %v44_v29, 1 }
 0x1d2   :  { %v54_v32 = vadd.f32 %v53_v30, %v52_v28  ;;  %v46_v33 = vadd.f32 %v45_v31, %v44_v29 }
 0x1d4   :  { %77 = vpush %v46_v33  ;;  %v55_v34 = vrot.slane %v54_v32, 1 }
 0x1d6   :  { %v56_v35 = vadd.f32 %v55_v34, %v54_v32 }
 0x1d8   :  { %79 = vpush %v56_v35 }
 0x205   :  { %s78_s0 = spop %77 }
 0x209   :  { %s80_s1 = spop %79 }
 0x20a   :  { %v58_v36 = vstv %s80_s1 }
 0x20b   :  { %91 = vrcp.f32 %v58_v36 }
 0x218   :  { %v92_v37 = vpop.eup %91 }
 0x219   :  { %81 = vpush %v92_v37 }
 0x24a   :  { %s82_s13 = spop %81 }
 0x24b   :  { %s61_s14 = smul.f32 %s82_s13, %s78_s0 }
 0x24d   :  { %63 = sst [smem:[#allocation2]] %s61_s14 }
 0x24e   :  { %71 = dma.smem_to_hbm %s105_s15, 16, %s132_s2, [#allocation3]  }
 0x24f   :  { %101 = dma.done.wait [#allocation3], 16  }
 0x250   :  { %102 = vsyncadd [#allocation3], 4294967280 }
 0x251   :  { %75 = sfence }
 0x252   :  { %76 = vsyncpa [#allocation3], 1 }

</bundles_post_ra>
